<compile_context>
chip_gen: v5e
topology: v5e:2x2
jax: 0.10.0
libtpu: 0.0.40
codegen_flags: <defaults>
</compile_context>

<pallas_src>
import numpy as np
import jax
import jax.numpy as jnp
from jax.experimental import pallas as pl
from jax.experimental.pallas import tpu as pltpu


def make_positional_encoding(d_model: int, max_len: int = 500) -> jnp.ndarray:
    """Deterministic buffer setup (matches the torch __init__). Returns (1, max_len, d_model) fp32."""
    position = np.arange(0, max_len, dtype=np.float32)[:, None]              # (max_len, 1)
    div_term = np.exp(np.arange(0, d_model, 2, dtype=np.float32)
                      * (-np.log(10000.0) / d_model))                        # (ceil(d/2),)
    pe = np.zeros((max_len, d_model), dtype=np.float32)
    pe[:, 0::2] = np.sin(position * div_term)
    cos_part = np.cos(position * div_term)
    pe[:, 1::2] = cos_part[:, : pe[:, 1::2].shape[1]]
    return jnp.asarray(pe[None, :, :])                                       # (1, max_len, d_model)


def _pe_add_kernel(x_ref, pe_ref, o_ref):
    # x_ref: (b_tile, s_tile, D), pe_ref: (1, s_tile, D) -> broadcast add over the
    # batch tile, computed in the (promoted) output dtype.
    o_ref[...] = x_ref[...].astype(o_ref.dtype) + pe_ref[...].astype(o_ref.dtype)


def _choose_tiles(B: int, S: int, D: int, itemsize: int, target_bytes: int = 2 << 20):
    """Pick (b_tile, s_tile); block is (b_tile, s_tile, D) with D at full extent (lane dim)."""
    row_bytes = max(1, D * itemsize)
    if S >= 8:
        # Sublane dim: multiple of 8, capped by the byte budget. Edge blocks (S % 8 != 0)
        # are masked by Pallas, so no full-extent fallback is needed.
        budget_s = max(8, (target_bytes // row_bytes) // 8 * 8)
        s_tile = min(max(8, (S // 8) * 8), budget_s)
    else:
        s_tile = S                       # tiny seq: full extent (allowed by the (8,128) rule)
    tile_bytes = max(1, s_tile * row_bytes)
    b_tile = max(1, min(B, target_bytes // tile_bytes))
    return b_tile, s_tile


def positional_encoding_forward(x: jnp.ndarray, pe: jnp.ndarray,
                                *, use_pallas: bool | None = None,
                                target_bytes: int = 2 << 20) -> jnp.ndarray:
    """x: (B, S, D);  pe: (1, max_len, D) fp32  ->  (B, S, D) with x + pe[:, :S]."""
    B, S, D = x.shape
    pe_s = pe[:, :S, :]                                   # layout-preserving slice (tiny; cache outside if desired)
    out_dtype = jnp.result_type(x.dtype, pe.dtype)        # torch-style type promotion

    if use_pallas is None:
        use_pallas = (B * S * D) >= (1 << 16)             # tiny inputs: plain XLA add is cheaper
    if not use_pallas:
        return x.astype(out_dtype) + pe_s.astype(out_dtype)

    itemsize = jnp.dtype(x.dtype).itemsize
    out_itemsize = jnp.dtype(out_dtype).itemsize
    b_tile, s_tile = _choose_tiles(B, S, D, itemsize, target_bytes)

    # Seq-tile axis outermost so the pe block index is constant across all batch
    # tiles within it -> Pallas skips the re-DMA and pe stays VMEM-resident.
    grid = (pl.cdiv(S, s_tile), pl.cdiv(B, b_tile))

    cost = pl.CostEstimate(
        flops=B * S * D,
        transcendentals=0,
        bytes_accessed=B * S * D * (itemsize + out_itemsize) + S * D * jnp.dtype(pe.dtype).itemsize,
    )

    out = pl.pallas_call(
        _pe_add_kernel,
        out_shape=jax.ShapeDtypeStruct((B, S, D), out_dtype),
        grid=grid,
        in_specs=[
            pl.BlockSpec((b_tile, s_tile, D), lambda s, b: (b, s, 0)),
            pl.BlockSpec((1, s_tile, D), lambda s, b: (0, s, 0)),   # pe: seq tile only
        ],
        out_specs=pl.BlockSpec((b_tile, s_tile, D), lambda s, b: (b, s, 0)),
        compiler_params=pltpu.CompilerParams(
            dimension_semantics=("parallel", "parallel"),
            vmem_limit_bytes=32 * 1024 * 1024,
        ),
        cost_estimate=cost,
    )(x, pe_s)

    return out


if __name__ == "__main__":
    batch, seq, d_model = 2, 8, 32
    max_len = 500

    key = jax.random.PRNGKey(0)
    x = jax.random.normal(key, (batch, seq, d_model), dtype=jnp.float32)

    pe = make_positional_encoding(d_model, max_len)

    # Force the Pallas path so the demo actually exercises the kernel.
    out = positional_encoding_forward(x, pe, use_pallas=True)
    out = jax.block_until_ready(out)

    # Reference check in plain JAX.
    ref = x + pe[:, :seq, :]
    np.testing.assert_allclose(np.asarray(out), np.asarray(ref), rtol=1e-6, atol=1e-6)

    print("KERNEL_OK")
</pallas_src>

<mosaic_0001>
module attributes {stable_mosaic.version = 11 : i64} {
  func.func @_pe_add_kernel(%arg0: i32, %arg1: i32, %arg2: memref<2x8x32xf32, #tpu.memory_space<vmem>>, %arg3: memref<1x8x32xf32, #tpu.memory_space<vmem>>, %arg4: memref<2x8x32xf32, #tpu.memory_space<vmem>>) attributes {dimension_semantics = [#tpu.dimension_semantics<parallel>, #tpu.dimension_semantics<parallel>], iteration_bounds = array<i64: 1, 1>, scalar_prefetch = 0 : i64, scratch_operands = 0 : i64, tpu.core_type = #tpu.core_type<tc>, window_params = [{transform_indices = @transform_0, window_bounds = array<i64: 2, 8, 32>}, {transform_indices = @transform_1, window_bounds = array<i64: 1, 8, 32>}, {transform_indices = @transform_2, window_bounds = array<i64: 2, 8, 32>}]} {
    %c0 = arith.constant 0 : index
    %c0_0 = arith.constant 0 : index
    %c0_1 = arith.constant 0 : index
    %0 = vector.load %arg2[%c0, %c0_0, %c0_1] : memref<2x8x32xf32, #tpu.memory_space<vmem>>, vector<2x8x32xf32>
    %c0_2 = arith.constant 0 : index
    %c0_3 = arith.constant 0 : index
    %c0_4 = arith.constant 0 : index
    %1 = vector.load %arg3[%c0_2, %c0_3, %c0_4] : memref<1x8x32xf32, #tpu.memory_space<vmem>>, vector<1x8x32xf32>
    %2 = vector.broadcast %1 : vector<1x8x32xf32> to vector<2x8x32xf32>
    %3 = arith.addf %0, %2 : vector<2x8x32xf32>
    %c0_5 = arith.constant 0 : index
    %c0_6 = arith.constant 0 : index
    %c0_7 = arith.constant 0 : index
    %4 = vector.load %arg4[%c0_5, %c0_6, %c0_7] : memref<2x8x32xf32, #tpu.memory_space<vmem>>, vector<2x8x32xf32>
    tpu.vector_store %arg4[%c0_5, %c0_6, %c0_7], %3 {strides = array<i32>} : memref<2x8x32xf32, #tpu.memory_space<vmem>>, vector<2x8x32xf32>,
    return
  }
  func.func @transform_0(%arg0: i32, %arg1: i32) -> (i32, i32, i32) {
    %c0_i32 = arith.constant 0 : i32
    %c0_i32_0 = arith.constant 0 : i32
    return %arg1, %arg0, %c0_i32 : i32, i32, i32
  }
  func.func @transform_1(%arg0: i32, %arg1: i32) -> (i32, i32, i32) {
    %c0_i32 = arith.constant 0 : i32
    %c0_i32_0 = arith.constant 0 : i32
    %c0_i32_1 = arith.constant 0 : i32
    return %c0_i32, %arg0, %c0_i32_0 : i32, i32, i32
  }
  func.func @transform_2(%arg0: i32, %arg1: i32) -> (i32, i32, i32) {
    %c0_i32 = arith.constant 0 : i32
    %c0_i32_0 = arith.constant 0 : i32
    return %arg1, %arg0, %c0_i32 : i32, i32, i32
  }
}

</mosaic_0001>

<bundles_post_ra>
// kernel: tpu_custom_call.1
= control target key start
LH: loop header
LB: loop body
LE: loop exit
PB: predicated region body
PF: predicated region fallthrough
CT: control target
= control target key end

     0   :  { %7 = vsyncpa [#allocation3], 0  ;;  %s182_s0 = inlined_call_operand.hbm [shape: f32[2,8,32], index: 0, kind: input, shape index: {}]   ;;  %s183_s1 = inlined_call_operand.hbm [shape: f32[1,8,32], index: 1, kind: input, shape index: {}]   ;;  %s184_s2 = inlined_call_operand.hbm [shape: f32[2,8,32], index: 2, kind: output, shape index: {}]  }
   0x1   :  { %8 = vsyncpa [#allocation6], 0 }
   0x2   :  { %9 = vsyncpa [#allocation4], 0  ;;  %s14_s11 = sshll.u32 %s182_s0, 4  ;;  %s153_s12 = smov [#allocation2]   ;;  %s15_s11 = int_to_ptr.hbm [resolvable:$true] %s14_s11 }
   0x3   :  { %s16_s13 = sshll.u32 %s153_s12, 4  ;;  %s28_s16 = sshll.u32 %s183_s1, 4  ;;  %s17_s13 = int_to_ptr.vmem [resolvable:$true] %s16_s13  ;;  %s29_s16 = int_to_ptr.hbm [resolvable:$true] %s28_s16 }
   0x4   :  { %s154_s17 = smov 128   ;;  %s155_s18 = smov 8  }
   0x5   :  { %22 = dma.hbm_to_vmem [thread:$0]  %s15_s11, 256, %s17_s13, [#allocation3], %s154_s17, %s154_s17, %s155_s18  }
   0x6   :  { %s156_s19 = smov [#allocation5]  }
   0x7   :  { %s30_s20 = sshll.u32 %s156_s19, 4  ;;  %s31_s20 = int_to_ptr.vmem [resolvable:$true] %s30_s20 }
   0x8   :  { %33 = dma.hbm_to_vmem [thread:$0]  %s29_s16, 128, %s31_s20, [#allocation6]  }
   0x9   :  { %147 = dma.done.wait [#allocation3], 256  }
   0xa   :  { %148 = vsyncadd [#allocation3], 4294967040 }
   0xb   :  { %149 = dma.done.wait [#allocation6], 128  }
   0xc   :  { %150 = vsyncadd [#allocation6], 4294967168  ;;  %s157_s0 = smov [#allocation7]   ;;  %s56_s24 = sshll.u32 %s184_s2, 4  ;;  %v42_v0 = vld [vmem:[#allocation2] sm:$0xff]  ;;  %v44_v1 = vld [vmem:[#allocation5] sm:$0xff]  ;;  %s57_s24 = int_to_ptr.hbm [resolvable:$true] %s56_s24 }
   0xd   :  { %s54_s21 = sshll.u32 %s157_s0, 4  ;;  %vm47_vm0 = vcmask 261120   ;;  %v43_v2 = vld [vmem:[#allocation2 + $0x8] sm:$0xff]  ;;  %v45_v3 = vadd.f32 %v44_v1, %v42_v0  ;;  %s55_s21 = int_to_ptr.vmem [resolvable:$true] %s54_s21 }
   0xe   :  { %v46_v4 = vadd.f32 %v44_v1, %v43_v2 }
   0xf   :  { %48 = vst.msk [vmem:[#allocation7] sm:$0xff] %vm47_vm0, %v45_v3 }
  0x10   :  { %49 = vst.msk [vmem:[#allocation7 + $0x8] sm:$0xff] %vm47_vm0, %v46_v4 }
  0x11   :  { %62 = dma.vmem_to_hbm [thread:$0]  %s55_s21, 256, %s57_s24, [#allocation4], %s154_s17, %s154_s17, %s155_s18  }
  0x12   :  { %151 = dma.done.wait [#allocation4], 256  }
  0x13   :  { %152 = vsyncadd [#allocation4], 4294967040 }
  0x14   :  { %67 = vsyncpa [#allocation3], 1 }
  0x15   :  { %68 = vsyncpa [#allocation6], 1 }
  0x16   :  { %69 = vsyncpa [#allocation4], 1 }

</bundles_post_ra>
